<compile_context>
chip_gen: v5e
topology: v5e:2x2
jax: 0.10.0
libtpu: 0.0.40
codegen_flags: <defaults>
</compile_context>

<pallas_src>
import functools

import jax
import jax.numpy as jnp
from jax import lax
from jax.experimental import pallas as pl
from jax.experimental.pallas import tpu as pltpu


def _round_up(x, m):
    return (x + m - 1) // m * m


_VMEM_LIMIT = 48 * 1024 * 1024  # leaves headroom inside v7x's 64 MiB VMEM


# ----------------------------------------------------------------------------
# Pallas kernel: out = maybe_relu(A @ W + b); A/W bf16 on the MXU, f32 accum.
# ----------------------------------------------------------------------------
def _mm_bias_kernel(a_ref, w_ref, b_ref, o_ref, *, relu):
    acc = jnp.dot(a_ref[...], w_ref[...], preferred_element_type=jnp.float32)
    acc = acc + b_ref[...]                       # (1, N) broadcasts over rows
    if relu:
        acc = jnp.maximum(acc, 0.0)
    o_ref[...] = acc.astype(o_ref.dtype)


def matmul_bias(a, w, b, *, relu, out_dtype=jnp.bfloat16, tm=512):
    """a: (M, K) bf16, w: (K, N) bf16, b: (1, N) f32 -> (M, N) out_dtype."""
    M, K = a.shape
    N = w.shape[1]
    tm_eff = min(tm, _round_up(M, 8))
    Mp = _round_up(M, tm_eff)
    if Mp != M:
        a = jnp.pad(a, ((0, Mp - M), (0, 0)))    # only activation rows, only if needed
    grid = (Mp // tm_eff,)

    out = pl.pallas_call(
        functools.partial(_mm_bias_kernel, relu=relu),
        out_shape=jax.ShapeDtypeStruct((Mp, N), out_dtype),
        grid=grid,
        in_specs=[
            pl.BlockSpec((tm_eff, K), lambda i: (i, 0)),   # A tile marches over M
            pl.BlockSpec((K, N), lambda i: (0, 0)),        # W resident across grid
            pl.BlockSpec((1, N), lambda i: (0, 0)),        # bias resident
        ],
        out_specs=pl.BlockSpec((tm_eff, N), lambda i: (i, 0)),
        compiler_params=pltpu.CompilerParams(
            dimension_semantics=("parallel",),             # megacore split on v7x
            vmem_limit_bytes=_VMEM_LIMIT,
        ),
        cost_estimate=pl.CostEstimate(
            flops=2 * Mp * K * N,
            transcendentals=0,
            bytes_accessed=(Mp * K * 2 + K * N * 2 + N * 4
                            + Mp * N * jnp.dtype(out_dtype).itemsize),
        ),
    )(a, w, b)
    return out[:M] if Mp != M else out


# ----------------------------------------------------------------------------
# Fused fc1 + ReLU + fc2 in one Pallas call (weights are only a few hundred KB).
# ----------------------------------------------------------------------------
def _fc_fused_kernel(h_ref, w1_ref, b1_ref, w2_ref, b2_ref, o_ref):
    h1 = jnp.dot(h_ref[...], w1_ref[...], preferred_element_type=jnp.float32)
    h1 = jnp.maximum(h1 + b1_ref[...], 0.0)
    q = jnp.dot(h1.astype(w2_ref.dtype), w2_ref[...],
                preferred_element_type=jnp.float32)
    o_ref[...] = q + b2_ref[...]


def fc_fused(h, w1, b1, w2, b2, *, tm=256):
    """h: (M, K) bf16; w1: (K, H) bf16; w2: (H, A) bf16 -> (M, A) f32."""
    M, K = h.shape
    Hd = w1.shape[1]
    A = w2.shape[1]
    tm_eff = min(tm, _round_up(M, 8))
    Mp = _round_up(M, tm_eff)
    if Mp != M:
        h = jnp.pad(h, ((0, Mp - M), (0, 0)))
    grid = (Mp // tm_eff,)

    out = pl.pallas_call(
        _fc_fused_kernel,
        out_shape=jax.ShapeDtypeStruct((Mp, A), jnp.float32),
        grid=grid,
        in_specs=[
            pl.BlockSpec((tm_eff, K), lambda i: (i, 0)),
            pl.BlockSpec((K, Hd), lambda i: (0, 0)),
            pl.BlockSpec((1, Hd), lambda i: (0, 0)),
            pl.BlockSpec((Hd, A), lambda i: (0, 0)),
            pl.BlockSpec((1, A), lambda i: (0, 0)),
        ],
        out_specs=pl.BlockSpec((tm_eff, A), lambda i: (i, 0)),
        compiler_params=pltpu.CompilerParams(
            dimension_semantics=("parallel",),
            vmem_limit_bytes=_VMEM_LIMIT,
        ),
        cost_estimate=pl.CostEstimate(
            flops=2 * Mp * K * Hd + 2 * Mp * Hd * A,
            transcendentals=0,
            bytes_accessed=(Mp * K * 2 + K * Hd * 2 + Hd * A * 2
                            + (Hd + A) * 4 + Mp * A * 4),
        ),
    )(h, w1, b1, w2, b2)
    return out[:M] if Mp != M else out


# ----------------------------------------------------------------------------
# Conv2d (VALID, stride s) via NHWC im2col + Pallas GEMM (+bias+ReLU fused)
# ----------------------------------------------------------------------------
def _im2col_nhwc(x, kh, kw, stride):
    """x: (N, H, W, C) -> (N*OH*OW, KH*KW*C); channels stay on the lane axis."""
    n, h, w, c = x.shape
    oh = (h - kh) // stride + 1
    ow = (w - kw) // stride + 1
    cols = []
    for i in range(kh):
        for j in range(kw):
            cols.append(x[:, i:i + stride * oh:stride, j:j + stride * ow:stride, :])
    p = jnp.concatenate(cols, axis=-1)             # (N, OH, OW, KH*KW*C)
    return p.reshape(n * oh * ow, kh * kw * c), oh, ow


def conv2d_relu_nhwc(x, w_mat, b, kh, kw, stride):
    """x: (N, H, W, C) bf16; w_mat: (KH*KW*C, O) bf16; returns NHWC bf16."""
    n = x.shape[0]
    patches, oh, ow = _im2col_nhwc(x, kh, kw, stride)
    out = matmul_bias(patches, w_mat, b, relu=True, out_dtype=jnp.bfloat16)
    return out.reshape(n, oh, ow, -1)


# ----------------------------------------------------------------------------
# Parameter preparation (done ONCE, outside the forward pass)
# ----------------------------------------------------------------------------
def _conv_out(n, k, s):
    return (n - k) // s + 1


def prepare_params(p, input_shape):
    """Torch-layout params -> kernel layout: im2col GEMM weights in (kh,kw,c)
    row order, bf16 cast, (1,N) f32 biases, 1/255 folded into conv1, fc1
    columns permuted to match the NHWC flatten."""
    c, h, w = input_shape
    oh1, ow1 = _conv_out(h, 8, 4), _conv_out(w, 8, 4)
    oh2, ow2 = _conv_out(oh1, 4, 2), _conv_out(ow1, 4, 2)
    oh3, ow3 = _conv_out(oh2, 3, 1), _conv_out(ow2, 3, 1)

    def conv_w(wt, scale=1.0):
        o, ci, kh, kw = wt.shape
        m = wt.transpose(2, 3, 1, 0).reshape(kh * kw * ci, o)   # rows = (kh, kw, c)
        return (m * scale).astype(jnp.bfloat16)

    # torch flatten of NCHW orders features as (c, h, w); ours is NHWC (h, w, c).
    wf1 = p["wf1"].reshape(-1, 64, oh3, ow3).transpose(0, 2, 3, 1)
    wf1 = wf1.reshape(p["wf1"].shape[0], -1)

    return {
        "w1": conv_w(p["w1"], 1.0 / 255.0),       # x/255 folded into conv1 weights
        "b1": p["b1"].astype(jnp.float32).reshape(1, -1),
        "w2": conv_w(p["w2"]),
        "b2": p["b2"].astype(jnp.float32).reshape(1, -1),
        "w3": conv_w(p["w3"]),
        "b3": p["b3"].astype(jnp.float32).reshape(1, -1),
        "wf1": wf1.T.astype(jnp.bfloat16),        # (linear_input_size, 512)
        "bf1": p["bf1"].astype(jnp.float32).reshape(1, -1),
        "wf2": p["wf2"].T.astype(jnp.bfloat16),   # (512, A)
        "bf2": p["bf2"].astype(jnp.float32).reshape(1, -1),
    }


# ----------------------------------------------------------------------------
# DQN forward (Pallas path)
# ----------------------------------------------------------------------------
def dqn_forward(x, kp):
    # Single NCHW -> NHWC relayout at the boundary; everything downstream NHWC.
    h = jnp.transpose(x, (0, 2, 3, 1)).astype(jnp.bfloat16)
    h = conv2d_relu_nhwc(h, kp["w1"], kp["b1"], 8, 8, 4)
    h = conv2d_relu_nhwc(h, kp["w2"], kp["b2"], 4, 4, 2)
    h = conv2d_relu_nhwc(h, kp["w3"], kp["b3"], 3, 3, 1)
    h = h.reshape(h.shape[0], -1)                  # NHWC flatten (wf1 pre-permuted)
    return fc_fused(h, kp["wf1"], kp["bf1"], kp["wf2"], kp["bf2"])


# ----------------------------------------------------------------------------
# Pure-JAX reference (torch layout / NCHW semantics, matched bf16 quantization)
# ----------------------------------------------------------------------------
def ref_forward(x, p):
    def q(v):
        return v.astype(jnp.bfloat16).astype(jnp.float32)

    def conv(h, wt, b, s):
        y = lax.conv_general_dilated(h, q(wt), (s, s), "VALID",
                                     dimension_numbers=("NCHW", "OIHW", "NCHW"))
        return q(jnp.maximum(y + b.reshape(1, -1, 1, 1), 0.0))

    h = q(x)
    h = conv(h, p["w1"] * (1.0 / 255.0), p["b1"], 4)
    h = conv(h, p["w2"], p["b2"], 2)
    h = conv(h, p["w3"], p["b3"], 1)
    h = h.reshape(h.shape[0], -1)
    h = q(jnp.maximum(h @ q(p["wf1"]).T + p["bf1"], 0.0))
    return h @ q(p["wf2"]).T + p["bf2"]


def init_params(key, in_channels, linear_input_size, num_actions):
    ks = jax.random.split(key, 10)
    s = 0.05
    return {
        "w1": s * jax.random.normal(ks[0], (32, in_channels, 8, 8), jnp.float32),
        "b1": s * jax.random.normal(ks[1], (32,), jnp.float32),
        "w2": s * jax.random.normal(ks[2], (64, 32, 4, 4), jnp.float32),
        "b2": s * jax.random.normal(ks[3], (64,), jnp.float32),
        "w3": s * jax.random.normal(ks[4], (64, 64, 3, 3), jnp.float32),
        "b3": s * jax.random.normal(ks[5], (64,), jnp.float32),
        "wf1": s * jax.random.normal(ks[6], (512, linear_input_size), jnp.float32),
        "bf1": s * jax.random.normal(ks[7], (512,), jnp.float32),
        "wf2": s * jax.random.normal(ks[8], (num_actions, 512), jnp.float32),
        "bf2": s * jax.random.normal(ks[9], (num_actions,), jnp.float32),
    }


if __name__ == "__main__":
    NUM_ACTIONS = 8              # len(DISCRETE_ACTIONS)
    B, C, H, W = 2, 4, 40, 40    # smallest clean size for the 8/4 -> 4/2 -> 3/1 stack

    oh1 = (H - 8) // 4 + 1       # 9
    oh2 = (oh1 - 4) // 2 + 1     # 3
    oh3 = oh2 - 2                # 1
    linear_input_size = 64 * oh3 * oh3

    key = jax.random.PRNGKey(0)
    kx, kp = jax.random.split(key)
    x = jax.random.uniform(kx, (B, C, H, W), jnp.float32, 0.0, 255.0)
    params = init_params(kp, C, linear_input_size, NUM_ACTIONS)
    kparams = prepare_params(params, (C, H, W))

    q = jax.jit(dqn_forward)(x, kparams)
    q = jax.block_until_ready(q)
    assert q.shape == (B, NUM_ACTIONS), q.shape

    q_ref = ref_forward(x, params)
    max_err = float(jnp.max(jnp.abs(q - q_ref)))
    assert jnp.allclose(q, q_ref, rtol=2e-2, atol=2e-2), max_err

    print("KERNEL_OK")
</pallas_src>

<mosaic_0001>
module attributes {stable_mosaic.version = 11 : i64} {
  func.func @_mm_bias_kernel(%arg0: i32, %arg1: memref<168x256xbf16, #tpu.memory_space<vmem>>, %arg2: memref<256x32xbf16, #tpu.memory_space<vmem>>, %arg3: memref<1x32xf32, #tpu.memory_space<vmem>>, %arg4: memref<168x32xbf16, #tpu.memory_space<vmem>>) attributes {dimension_semantics = [#tpu.dimension_semantics<parallel>], iteration_bounds = array<i64: 1>, scalar_prefetch = 0 : i64, scratch_operands = 0 : i64, tpu.core_type = #tpu.core_type<tc>, window_params = [{transform_indices = @transform_0, window_bounds = array<i64: 168, 256>}, {pipeline_mode = #tpu.pipeline_mode<synchronous>, transform_indices = @transform_1, window_bounds = array<i64: 256, 32>}, {pipeline_mode = #tpu.pipeline_mode<synchronous>, transform_indices = @transform_2, window_bounds = array<i64: 1, 32>}, {transform_indices = @transform_3, window_bounds = array<i64: 168, 32>}]} {
    %c0 = arith.constant 0 : index
    %c0_0 = arith.constant 0 : index
    %0 = vector.load %arg1[%c0, %c0_0] : memref<168x256xbf16, #tpu.memory_space<vmem>>, vector<168x256xbf16>
    %c0_1 = arith.constant 0 : index
    %c0_2 = arith.constant 0 : index
    %1 = vector.load %arg2[%c0_1, %c0_2] : memref<256x32xbf16, #tpu.memory_space<vmem>>, vector<256x32xbf16>
    %cst = arith.constant dense<0.000000e+00> : vector<168x32xf32>
    %2 = tpu.matmul %0, %1, %cst {dimension_numbers = #tpu.dot_dimension_numbers<[1], [0], [0], [1], [0, 0, 1, 1], [], []>} : vector<168x256xbf16>, vector<256x32xbf16>, vector<168x32xf32> -> vector<168x32xf32>
    %c0_3 = arith.constant 0 : index
    %c0_4 = arith.constant 0 : index
    %3 = vector.load %arg3[%c0_3, %c0_4] : memref<1x32xf32, #tpu.memory_space<vmem>>, vector<1x32xf32>
    %4 = vector.broadcast %3 : vector<1x32xf32> to vector<168x32xf32>
    %5 = arith.addf %2, %4 : vector<168x32xf32>
    %cst_5 = arith.constant 0.000000e+00 : f32
    %6 = vector.broadcast %cst_5 : f32 to vector<168x32xf32>
    %7 = arith.maximumf %5, %6 : vector<168x32xf32>
    %8 = arith.truncf %7 : vector<168x32xf32> to vector<168x32xbf16>
    %c0_6 = arith.constant 0 : index
    %c0_7 = arith.constant 0 : index
    %9 = vector.load %arg4[%c0_6, %c0_7] : memref<168x32xbf16, #tpu.memory_space<vmem>>, vector<168x32xbf16>
    tpu.vector_store %arg4[%c0_6, %c0_7], %8 {strides = array<i32>} : memref<168x32xbf16, #tpu.memory_space<vmem>>, vector<168x32xbf16>,
    return
  }
  func.func @transform_0(%arg0: i32) -> (i32, i32) {
    %c0_i32 = arith.constant 0 : i32
    %c0_i32_0 = arith.constant 0 : i32
    return %arg0, %c0_i32 : i32, i32
  }
  func.func @transform_1(%arg0: i32) -> (i32, i32) {
    %c0_i32 = arith.constant 0 : i32
    %c0_i32_0 = arith.constant 0 : i32
    %c0_i32_1 = arith.constant 0 : i32
    return %c0_i32, %c0_i32_0 : i32, i32
  }
  func.func @transform_2(%arg0: i32) -> (i32, i32) {
    %c0_i32 = arith.constant 0 : i32
    %c0_i32_0 = arith.constant 0 : i32
    %c0_i32_1 = arith.constant 0 : i32
    return %c0_i32, %c0_i32_0 : i32, i32
  }
  func.func @transform_3(%arg0: i32) -> (i32, i32) {
    %c0_i32 = arith.constant 0 : i32
    %c0_i32_0 = arith.constant 0 : i32
    return %arg0, %c0_i32 : i32, i32
  }
}

module attributes {stable_mosaic.version = 11 : i64} {
  func.func @_mm_bias_kernel(%arg0: i32, %arg1: memref<24x512xbf16, #tpu.memory_space<vmem>>, %arg2: memref<512x64xbf16, #tpu.memory_space<vmem>>, %arg3: memref<1x64xf32, #tpu.memory_space<vmem>>, %arg4: memref<24x64xbf16, #tpu.memory_space<vmem>>) attributes {dimension_semantics = [#tpu.dimension_semantics<parallel>], iteration_bounds = array<i64: 1>, scalar_prefetch = 0 : i64, scratch_operands = 0 : i64, tpu.core_type = #tpu.core_type<tc>, window_params = [{transform_indices = @transform_0, window_bounds = array<i64: 24, 512>}, {pipeline_mode = #tpu.pipeline_mode<synchronous>, transform_indices = @transform_1, window_bounds = array<i64: 512, 64>}, {pipeline_mode = #tpu.pipeline_mode<synchronous>, transform_indices = @transform_2, window_bounds = array<i64: 1, 64>}, {transform_indices = @transform_3, window_bounds = array<i64: 24, 64>}]} {
    %c0 = arith.constant 0 : index
    %c0_0 = arith.constant 0 : index
    %0 = vector.load %arg1[%c0, %c0_0] : memref<24x512xbf16, #tpu.memory_space<vmem>>, vector<24x512xbf16>
    %c0_1 = arith.constant 0 : index
    %c0_2 = arith.constant 0 : index
    %1 = vector.load %arg2[%c0_1, %c0_2] : memref<512x64xbf16, #tpu.memory_space<vmem>>, vector<512x64xbf16>
    %cst = arith.constant dense<0.000000e+00> : vector<24x64xf32>
    %2 = tpu.matmul %0, %1, %cst {dimension_numbers = #tpu.dot_dimension_numbers<[1], [0], [0], [1], [0, 0, 1, 1], [], []>} : vector<24x512xbf16>, vector<512x64xbf16>, vector<24x64xf32> -> vector<24x64xf32>
    %c0_3 = arith.constant 0 : index
    %c0_4 = arith.constant 0 : index
    %3 = vector.load %arg3[%c0_3, %c0_4] : memref<1x64xf32, #tpu.memory_space<vmem>>, vector<1x64xf32>
    %4 = vector.broadcast %3 : vector<1x64xf32> to vector<24x64xf32>
    %5 = arith.addf %2, %4 : vector<24x64xf32>
    %cst_5 = arith.constant 0.000000e+00 : f32
    %6 = vector.broadcast %cst_5 : f32 to vector<24x64xf32>
    %7 = arith.maximumf %5, %6 : vector<24x64xf32>
    %8 = arith.truncf %7 : vector<24x64xf32> to vector<24x64xbf16>
    %c0_6 = arith.constant 0 : index
    %c0_7 = arith.constant 0 : index
    %9 = vector.load %arg4[%c0_6, %c0_7] : memref<24x64xbf16, #tpu.memory_space<vmem>>, vector<24x64xbf16>
    tpu.vector_store %arg4[%c0_6, %c0_7], %8 {strides = array<i32>} : memref<24x64xbf16, #tpu.memory_space<vmem>>, vector<24x64xbf16>,
    return
  }
  func.func @transform_0(%arg0: i32) -> (i32, i32) {
    %c0_i32 = arith.constant 0 : i32
    %c0_i32_0 = arith.constant 0 : i32
    return %arg0, %c0_i32 : i32, i32
  }
  func.func @transform_1(%arg0: i32) -> (i32, i32) {
    %c0_i32 = arith.constant 0 : i32
    %c0_i32_0 = arith.constant 0 : i32
    %c0_i32_1 = arith.constant 0 : i32
    return %c0_i32, %c0_i32_0 : i32, i32
  }
  func.func @transform_2(%arg0: i32) -> (i32, i32) {
    %c0_i32 = arith.constant 0 : i32
    %c0_i32_0 = arith.constant 0 : i32
    %c0_i32_1 = arith.constant 0 : i32
    return %c0_i32, %c0_i32_0 : i32, i32
  }
  func.func @transform_3(%arg0: i32) -> (i32, i32) {
    %c0_i32 = arith.constant 0 : i32
    %c0_i32_0 = arith.constant 0 : i32
    return %arg0, %c0_i32 : i32, i32
  }
}

module attributes {stable_mosaic.version = 11 : i64} {
  func.func @_mm_bias_kernel(%arg0: i32, %arg1: memref<8x576xbf16, #tpu.memory_space<vmem>>, %arg2: memref<576x64xbf16, #tpu.memory_space<vmem>>, %arg3: memref<1x64xf32, #tpu.memory_space<vmem>>, %arg4: memref<8x64xbf16, #tpu.memory_space<vmem>>) attributes {dimension_semantics = [#tpu.dimension_semantics<parallel>], iteration_bounds = array<i64: 1>, scalar_prefetch = 0 : i64, scratch_operands = 0 : i64, tpu.core_type = #tpu.core_type<tc>, window_params = [{transform_indices = @transform_0, window_bounds = array<i64: 8, 576>}, {pipeline_mode = #tpu.pipeline_mode<synchronous>, transform_indices = @transform_1, window_bounds = array<i64: 576, 64>}, {pipeline_mode = #tpu.pipeline_mode<synchronous>, transform_indices = @transform_2, window_bounds = array<i64: 1, 64>}, {transform_indices = @transform_3, window_bounds = array<i64: 8, 64>}]} {
    %c0 = arith.constant 0 : index
    %c0_0 = arith.constant 0 : index
    %0 = vector.load %arg1[%c0, %c0_0] : memref<8x576xbf16, #tpu.memory_space<vmem>>, vector<8x576xbf16>
    %c0_1 = arith.constant 0 : index
    %c0_2 = arith.constant 0 : index
    %1 = vector.load %arg2[%c0_1, %c0_2] : memref<576x64xbf16, #tpu.memory_space<vmem>>, vector<576x64xbf16>
    %cst = arith.constant dense<0.000000e+00> : vector<8x64xf32>
    %2 = tpu.matmul %0, %1, %cst {dimension_numbers = #tpu.dot_dimension_numbers<[1], [0], [0], [1], [0, 0, 1, 1], [], []>} : vector<8x576xbf16>, vector<576x64xbf16>, vector<8x64xf32> -> vector<8x64xf32>
    %c0_3 = arith.constant 0 : index
    %c0_4 = arith.constant 0 : index
    %3 = vector.load %arg3[%c0_3, %c0_4] : memref<1x64xf32, #tpu.memory_space<vmem>>, vector<1x64xf32>
    %4 = vector.broadcast %3 : vector<1x64xf32> to vector<8x64xf32>
    %5 = arith.addf %2, %4 : vector<8x64xf32>
    %cst_5 = arith.constant 0.000000e+00 : f32
    %6 = vector.broadcast %cst_5 : f32 to vector<8x64xf32>
    %7 = arith.maximumf %5, %6 : vector<8x64xf32>
    %8 = arith.truncf %7 : vector<8x64xf32> to vector<8x64xbf16>
    %c0_6 = arith.constant 0 : index
    %c0_7 = arith.constant 0 : index
    %9 = vector.load %arg4[%c0_6, %c0_7] : memref<8x64xbf16, #tpu.memory_space<vmem>>, vector<8x64xbf16>
    tpu.vector_store %arg4[%c0_6, %c0_7], %8 {strides = array<i32>} : memref<8x64xbf16, #tpu.memory_space<vmem>>, vector<8x64xbf16>,
    return
  }
  func.func @transform_0(%arg0: i32) -> (i32, i32) {
    %c0_i32 = arith.constant 0 : i32
    %c0_i32_0 = arith.constant 0 : i32
    return %arg0, %c0_i32 : i32, i32
  }
  func.func @transform_1(%arg0: i32) -> (i32, i32) {
    %c0_i32 = arith.constant 0 : i32
    %c0_i32_0 = arith.constant 0 : i32
    %c0_i32_1 = arith.constant 0 : i32
    return %c0_i32, %c0_i32_0 : i32, i32
  }
  func.func @transform_2(%arg0: i32) -> (i32, i32) {
    %c0_i32 = arith.constant 0 : i32
    %c0_i32_0 = arith.constant 0 : i32
    %c0_i32_1 = arith.constant 0 : i32
    return %c0_i32, %c0_i32_0 : i32, i32
  }
  func.func @transform_3(%arg0: i32) -> (i32, i32) {
    %c0_i32 = arith.constant 0 : i32
    %c0_i32_0 = arith.constant 0 : i32
    return %arg0, %c0_i32 : i32, i32
  }
}

module attributes {stable_mosaic.version = 11 : i64} {
  func.func @_fc_fused_kernel(%arg0: i32, %arg1: memref<8x64xbf16, #tpu.memory_space<vmem>>, %arg2: memref<64x512xbf16, #tpu.memory_space<vmem>>, %arg3: memref<1x512xf32, #tpu.memory_space<vmem>>, %arg4: memref<512x8xbf16, #tpu.memory_space<vmem>>, %arg5: memref<1x8xf32, #tpu.memory_space<vmem>>, %arg6: memref<8x8xf32, #tpu.memory_space<vmem>>) attributes {dimension_semantics = [#tpu.dimension_semantics<parallel>], iteration_bounds = array<i64: 1>, scalar_prefetch = 0 : i64, scratch_operands = 0 : i64, tpu.core_type = #tpu.core_type<tc>, window_params = [{transform_indices = @transform_0, window_bounds = array<i64: 8, 64>}, {pipeline_mode = #tpu.pipeline_mode<synchronous>, transform_indices = @transform_1, window_bounds = array<i64: 64, 512>}, {pipeline_mode = #tpu.pipeline_mode<synchronous>, transform_indices = @transform_2, window_bounds = array<i64: 1, 512>}, {pipeline_mode = #tpu.pipeline_mode<synchronous>, transform_indices = @transform_3, window_bounds = array<i64: 512, 8>}, {pipeline_mode = #tpu.pipeline_mode<synchronous>, transform_indices = @transform_4, window_bounds = array<i64: 1, 8>}, {transform_indices = @transform_5, window_bounds = array<i64: 8, 8>}]} {
    %c0 = arith.constant 0 : index
    %c0_0 = arith.constant 0 : index
    %0 = vector.load %arg1[%c0, %c0_0] : memref<8x64xbf16, #tpu.memory_space<vmem>>, vector<8x64xbf16>
    %c0_1 = arith.constant 0 : index
    %c0_2 = arith.constant 0 : index
    %1 = vector.load %arg2[%c0_1, %c0_2] : memref<64x512xbf16, #tpu.memory_space<vmem>>, vector<64x512xbf16>
    %cst = arith.constant dense<0.000000e+00> : vector<8x512xf32>
    %2 = tpu.matmul %0, %1, %cst {dimension_numbers = #tpu.dot_dimension_numbers<[1], [0], [0], [1], [0, 0, 1, 1], [], []>} : vector<8x64xbf16>, vector<64x512xbf16>, vector<8x512xf32> -> vector<8x512xf32>
    %c0_3 = arith.constant 0 : index
    %c0_4 = arith.constant 0 : index
    %3 = vector.load %arg3[%c0_3, %c0_4] : memref<1x512xf32, #tpu.memory_space<vmem>>, vector<1x512xf32>
    %4 = vector.broadcast %3 : vector<1x512xf32> to vector<8x512xf32>
    %5 = arith.addf %2, %4 : vector<8x512xf32>
    %cst_5 = arith.constant 0.000000e+00 : f32
    %6 = vector.broadcast %cst_5 : f32 to vector<8x512xf32>
    %7 = arith.maximumf %5, %6 : vector<8x512xf32>
    %8 = arith.truncf %7 : vector<8x512xf32> to vector<8x512xbf16>
    %c0_6 = arith.constant 0 : index
    %c0_7 = arith.constant 0 : index
    %9 = vector.load %arg4[%c0_6, %c0_7] : memref<512x8xbf16, #tpu.memory_space<vmem>>, vector<512x8xbf16>
    %cst_8 = arith.constant dense<0.000000e+00> : vector<8x8xf32>
    %10 = tpu.matmul %8, %9, %cst_8 {dimension_numbers = #tpu.dot_dimension_numbers<[1], [0], [0], [1], [0, 0, 1, 1], [], []>} : vector<8x512xbf16>, vector<512x8xbf16>, vector<8x8xf32> -> vector<8x8xf32>
    %c0_9 = arith.constant 0 : index
    %c0_10 = arith.constant 0 : index
    %11 = vector.load %arg5[%c0_9, %c0_10] : memref<1x8xf32, #tpu.memory_space<vmem>>, vector<1x8xf32>
    %12 = vector.broadcast %11 : vector<1x8xf32> to vector<8x8xf32>
    %13 = arith.addf %10, %12 : vector<8x8xf32>
    %c0_11 = arith.constant 0 : index
    %c0_12 = arith.constant 0 : index
    %14 = vector.load %arg6[%c0_11, %c0_12] : memref<8x8xf32, #tpu.memory_space<vmem>>, vector<8x8xf32>
    tpu.vector_store %arg6[%c0_11, %c0_12], %13 {strides = array<i32>} : memref<8x8xf32, #tpu.memory_space<vmem>>, vector<8x8xf32>,
    return
  }
  func.func @transform_0(%arg0: i32) -> (i32, i32) {
    %c0_i32 = arith.constant 0 : i32
    %c0_i32_0 = arith.constant 0 : i32
    return %arg0, %c0_i32 : i32, i32
  }
  func.func @transform_1(%arg0: i32) -> (i32, i32) {
    %c0_i32 = arith.constant 0 : i32
    %c0_i32_0 = arith.constant 0 : i32
    %c0_i32_1 = arith.constant 0 : i32
    return %c0_i32, %c0_i32_0 : i32, i32
  }
  func.func @transform_2(%arg0: i32) -> (i32, i32) {
    %c0_i32 = arith.constant 0 : i32
    %c0_i32_0 = arith.constant 0 : i32
    %c0_i32_1 = arith.constant 0 : i32
    return %c0_i32, %c0_i32_0 : i32, i32
  }
  func.func @transform_3(%arg0: i32) -> (i32, i32) {
    %c0_i32 = arith.constant 0 : i32
    %c0_i32_0 = arith.constant 0 : i32
    %c0_i32_1 = arith.constant 0 : i32
    return %c0_i32, %c0_i32_0 : i32, i32
  }
  func.func @transform_4(%arg0: i32) -> (i32, i32) {
    %c0_i32 = arith.constant 0 : i32
    %c0_i32_0 = arith.constant 0 : i32
    %c0_i32_1 = arith.constant 0 : i32
    return %c0_i32, %c0_i32_0 : i32, i32
  }
  func.func @transform_5(%arg0: i32) -> (i32, i32) {
    %c0_i32 = arith.constant 0 : i32
    %c0_i32_0 = arith.constant 0 : i32
    return %arg0, %c0_i32 : i32, i32
  }
}

</mosaic_0001>

<bundles_post_ra>
// kernel: dqn_forward.4
= control target key start
LH: loop header
LB: loop body
LE: loop exit
PB: predicated region body
PF: predicated region fallthrough
CT: control target
= control target key end

     0   :  { %vm442_vm0 = vcmask 257024   ;;  %s972_s1 = inlined_call_operand.vmem [shape: bf16[256,32], index: 1, kind: input, shape index: {}]   ;;  %s973_s2 = inlined_call_operand.vmem [shape: f32[1,32], index: 2, kind: input, shape index: {}]   ;;  %s974_s0 = inlined_call_operand.vmem [shape: bf16[168,256], index: 0, kind: input, shape index: {}]   ;;  %s975_s3 = inlined_call_operand.vmem [shape: bf16[168,32], index: 3, kind: output, shape index: {}]  }
   0x1   :  { %v639_v0 = vld [vmem:[%s972_s1 + $0x38] sm:$0xff]  ;;  %v638_v2 = vld [vmem:[%s972_s1 + $0x30] sm:$0xff]  ;;  %v637_v4 = vld [vmem:[%s972_s1 + $0x28] sm:$0xff] }
   0x2   :  { %v647_v1 = vld [vmem:[%s972_s1 + $0x78] sm:$0xff]  ;;  %274 = vmatpush.bf16.msra.mxu0 %v639_v0  ;;  %648 = vmatpush.bf16.msra.mxu2 %v639_v0  ;;  %v646_v3 = vld [vmem:[%s972_s1 + $0x70] sm:$0xff]  ;;  %v645_v5 = vld [vmem:[%s972_s1 + $0x68] sm:$0xff] }
   0x3   :  { %337 = vmatpush.bf16.msra.mxu1 %v647_v1  ;;  %656 = vmatpush.bf16.msra.mxu3 %v647_v1  ;;  %v636_v6 = vld [vmem:[%s972_s1 + $0x20] sm:$0xff]  ;;  %v635_v8 = vld [vmem:[%s972_s1 + $0x18] sm:$0xff]  ;;  %v634_v10 = vld [vmem:[%s972_s1 + $0x10] sm:$0xff] }
   0x4   :  { %v644_v7 = vld [vmem:[%s972_s1 + $0x60] sm:$0xff]  ;;  %v643_v9 = vld [vmem:[%s972_s1 + $0x58] sm:$0xff]  ;;  %v642_v11 = vld [vmem:[%s972_s1 + $0x50] sm:$0xff] }
   0x5   :  { %v633_v12 = vld [vmem:[%s972_s1 + $0x8] sm:$0xff]  ;;  %v632_v14 = vld [vmem:[%s972_s1] sm:$0xff]  ;;  %v510_v18 = vld [vmem:[%s974_s0 + $0x50] sm:$0xf] }
   0x6   :  { %275 = vmatpush.bf16.msra.mxu0 %v638_v2  ;;  %649 = vmatpush.bf16.msra.mxu2 %v638_v2  ;;  %v641_v13 = vld [vmem:[%s972_s1 + $0x48] sm:$0xff]  ;;  %v640_v15 = vld [vmem:[%s972_s1 + $0x40] sm:$0xff]  ;;  %v623_v19 = vld [vmem:[%s974_s0 + $0x54] sm:$0xf0] }
   0x7   :  { %338 = vmatpush.bf16.msra.mxu1 %v646_v3  ;;  %657 = vmatpush.bf16.msra.mxu3 %v646_v3  ;;  %v470_v16 = vld [vmem:[%s974_s0] sm:$0xf]  ;;  %v613_v17 = vld [vmem:[%s974_s0 + $0x4] sm:$0xf0]  ;;  %v612_v20 = vld [vmem:[%s974_s0 + $0x4] sm:$0xf]  ;;  %v511_v25 = vor.u32 %v623_v19, %v510_v18 }
   0x8   :  { %v472_v21 = vld [vmem:[%s974_s0 + $0x8] sm:$0xf0]  ;;  %v624_v22 = vld [vmem:[%s974_s0 + $0x64] sm:$0xf]  ;;  %v471_v24 = vor.u32 %v613_v17, %v470_v16  ;;  %v478_v28 = vld [vmem:[%s974_s0 + $0x10] sm:$0xf] }
   0x9   :  { %v520_v23 = vld [vmem:[%s974_s0 + $0x68] sm:$0xf0]  ;;  %v475_v26 = vor.u32 %v612_v20, %v472_v21  ;;  %v615_v29 = vld [vmem:[%s974_s0 + $0x14] sm:$0xf0]  ;;  %v518_v30 = vld [vmem:[%s974_s0 + $0x60] sm:$0xf] }
   0xa   :  { %276 = vmatpush.bf16.msra.mxu0 %v637_v4  ;;  %650 = vmatpush.bf16.msra.mxu2 %v637_v4  ;;  %v523_v27 = vor.u32 %v624_v22, %v520_v23  ;;  %v625_v31 = vld [vmem:[%s974_s0 + $0x64] sm:$0xf0]  ;;  %v614_v32 = vld [vmem:[%s974_s0 + $0x14] sm:$0xf]  ;;  %v480_v33 = vld [vmem:[%s974_s0 + $0x18] sm:$0xf0]  ;;  %v479_v36 = vor.u32 %v615_v29, %v478_v28 }
   0xb   :  { %339 = vmatpush.bf16.msra.mxu1 %v645_v5  ;;  %658 = vmatpush.bf16.msra.mxu3 %v645_v5  ;;  %v626_v34 = vld [vmem:[%s974_s0 + $0x74] sm:$0xf]  ;;  %v528_v35 = vld [vmem:[%s974_s0 + $0x78] sm:$0xf0]  ;;  %v519_v37 = vor.u32 %v625_v31, %v518_v30  ;;  %v483_v38 = vor.u32 %v614_v32, %v480_v33  ;;  %v486_v40 = vld [vmem:[%s974_s0 + $0x20] sm:$0xf] }
   0xc   :  { %v531_v39 = vor.u32 %v626_v34, %v528_v35  ;;  %v617_v41 = vld [vmem:[%s974_s0 + $0x24] sm:$0xf0]  ;;  %v526_v42 = vld [vmem:[%s974_s0 + $0x70] sm:$0xf]  ;;  %v627_v43 = vld [vmem:[%s974_s0 + $0x74] sm:$0xf0] }
   0xd   :  { %v616_v44 = vld [vmem:[%s974_s0 + $0x24] sm:$0xf]  ;;  %v488_v45 = vld [vmem:[%s974_s0 + $0x28] sm:$0xf0]  ;;  %v487_v48 = vor.u32 %v617_v41, %v486_v40  ;;  %v527_v49 = vor.u32 %v627_v43, %v526_v42  ;;  %v494_v52 = vld [vmem:[%s974_s0 + $0x30] sm:$0xf] }
   0xe   :  { %277 = vmatpush.bf16.msra.mxu0 %v636_v6  ;;  %651 = vmatpush.bf16.msra.mxu2 %v636_v6  ;;  %v628_v46 = vld [vmem:[%s974_s0 + $0x84] sm:$0xf]  ;;  %v536_v47 = vld [vmem:[%s974_s0 + $0x88] sm:$0xf0]  ;;  %v491_v50 = vor.u32 %v616_v44, %v488_v45  ;;  %v619_v53 = vld [vmem:[%s974_s0 + $0x34] sm:$0xf0] }
   0xf   :  { %340 = vmatpush.bf16.msra.mxu1 %v644_v7  ;;  %659 = vmatpush.bf16.msra.mxu3 %v644_v7  ;;  %v539_v51 = vor.u32 %v628_v46, %v536_v47  ;;  %v534_v54 = vld [vmem:[%s974_s0 + $0x80] sm:$0xf]  ;;  %v629_v55 = vld [vmem:[%s974_s0 + $0x84] sm:$0xf0]  ;;  %v618_v56 = vld [vmem:[%s974_s0 + $0x34] sm:$0xf]  ;;  %v495_v60 = vor.u32 %v619_v53, %v494_v52 }
  0x10   :  { %v496_v57 = vld [vmem:[%s974_s0 + $0x38] sm:$0xf0]  ;;  %v630_v58 = vld [vmem:[%s974_s0 + $0x94] sm:$0xf]  ;;  %v535_v61 = vor.u32 %v629_v55, %v534_v54  ;;  %v34_v0 = vld [vmem:[%s974_s0 + $0xa0] sm:$0xff] }
  0x11   :  { %v544_v59 = vld [vmem:[%s974_s0 + $0x98] sm:$0xf0]  ;;  %v499_v62 = vor.u32 %v618_v56, %v496_v57  ;;  %v502_v1 = vld [vmem:[%s974_s0 + $0x40] sm:$0xf]  ;;  %v621_v2 = vld [vmem:[%s974_s0 + $0x44] sm:$0xf0]  ;;  %v133_v5 = vunpack.c.h.b16 %v34_v0 }
  0x12   :  { %278 = vmatpush.bf16.msra.mxu0 %v635_v8  ;;  %652 = vmatpush.bf16.msra.mxu2 %v635_v8  ;;  %v547_v63 = vor.u32 %v630_v58, %v544_v59  ;;  %v542_v3 = vld [vmem:[%s974_s0 + $0x90] sm:$0xf]  ;;  %v631_v4 = vld [vmem:[%s974_s0 + $0x94] sm:$0xf0]  ;;  %v620_v6 = vld [vmem:[%s974_s0 + $0x44] sm:$0xf]  ;;  %v503_v8 = vor.u32 %v621_v2, %v502_v1 }
  0x13   :  { %341 = vmatpush.bf16.msra.mxu1 %v643_v9  ;;  %660 = vmatpush.bf16.msra.mxu3 %v643_v9  ;;  %v504_v7 = vld [vmem:[%s974_s0 + $0x48] sm:$0xf0]  ;;  %v543_v9 = vor.u32 %v631_v4, %v542_v3  ;;  %v859_v17 = vld [vmem:[%s973_s2] ss:$0 sm:$0xff] }
  0x16   :  { %279 = vmatpush.bf16.msra.mxu0 %v634_v10  ;;  %653 = vmatpush.bf16.msra.mxu2 %v634_v10  ;;  %v507_v10 = vor.u32 %v620_v6, %v504_v7 }
  0x17   :  { %342 = vmatpush.bf16.msra.mxu1 %v642_v11  ;;  %661 = vmatpush.bf16.msra.mxu3 %v642_v11  ;;  %v155_v11 = vpack.c.b16 %v133_v5, %v133_v5 }
  0x1a   :  { %280 = vmatpush.bf16.msra.mxu0 %v633_v12  ;;  %654 = vmatpush.bf16.msra.mxu2 %v633_v12  ;;  %v132_v12 = vunpack.c.l.b16 %v34_v0 }
  0x1b   :  { %343 = vmatpush.bf16.msra.mxu1 %v641_v13  ;;  %662 = vmatpush.bf16.msra.mxu3 %v641_v13  ;;  %v622_v13 = vld [vmem:[%s974_s0 + $0x54] sm:$0xf] }
  0x1e   :  { %281 = vmatpush.bf16.msra.mxu0 %v632_v14  ;;  %655 = vmatpush.bf16.msra.mxu2 %v632_v14  ;;  %v512_v14 = vld [vmem:[%s974_s0 + $0x58] sm:$0xf0] }
  0x1f   :  { %344 = vmatpush.bf16.msra.mxu1 %v640_v15  ;;  %663 = vmatpush.bf16.msra.mxu3 %v640_v15  ;;  %v154_v15 = vpack.c.b16 %v132_v12, %v132_v12  ;;  %v515_v16 = vor.u32 %v622_v13, %v512_v14 }
  0x21   :  { %282 = vmatmul.bf16.vlgmr.msra.gmra.mxu0 %v471_v24  ;;  %307 = vmatmul.bf16.vlgmr.msra.gmra.mxu2 %v511_v25 }
  0x22   :  { %345 = vmatmul.bf16.vlgmr.msra.gmra.mxu1 %v475_v26  ;;  %375 = vmatmul.bf16.vlgmr.msra.gmra.mxu3 %v523_v27 }
  0x31   :  { %287 = vmatmul.bf16.gmra.mxu0 %v479_v36  ;;  %312 = vmatmul.bf16.gmra.mxu2 %v519_v37 }
  0x32   :  { %350 = vmatmul.bf16.gmra.mxu1 %v483_v38  ;;  %380 = vmatmul.bf16.gmra.mxu3 %v531_v39 }
  0x41   :  { %292 = vmatmul.bf16.gmra.mxu0 %v487_v48  ;;  %317 = vmatmul.bf16.gmra.mxu2 %v527_v49 }
  0x42   :  { %355 = vmatmul.bf16.gmra.mxu1 %v491_v50  ;;  %385 = vmatmul.bf16.gmra.mxu3 %v539_v51 }
  0x51   :  { %297 = vmatmul.bf16.gmra.mxu0 %v495_v60  ;;  %322 = vmatmul.bf16.gmra.mxu2 %v535_v61 }
  0x52   :  { %360 = vmatmul.bf16.gmra.mxu1 %v499_v62  ;;  %390 = vmatmul.bf16.gmra.mxu3 %v547_v63 }
  0x61   :  { %302 = vmatmul.bf16.gmra.mxu0 %v503_v8  ;;  %327 = vmatmul.bf16.gmra.mxu2 %v543_v9 }
  0x62   :  { %365 = vmatmul.bf16.gmra.mxu1 %v507_v10  ;;  %395 = vmatmul.bf16.gmra.mxu3 %v155_v11 }
  0x71   :  { %332 = vmatmul.bf16.gmra.mxu2 %v154_v15 }
  0x72   :  { %370 = vmatmul.bf16.gmra.mxu1 %v515_v16 }
  0x9e   :  { %v283_v18 = vpop.f32.mrf.mxu0 }
  0x9f   :  { %v284_v19 = vadd.f32 %v859_v17, %v283_v18  ;;  %v346_v20 = vpop.f32.mrf.mxu1 }
  0xa1   :  { %v347_v21 = vadd.f32 %v346_v20, %v284_v19 }
  0xa3   :  { %v400_v22 = vmax.f32 %v347_v21, 0.0 }
  0xa4   :  { %v862_v23 = vpop.f32.mrf.mxu2 }
  0xa5   :  { %v421_v24 = vpack.c.bf16 %v400_v22, %v400_v22  ;;  %v376_v25 = vpop.f32.mrf.mxu3 }
  0xa6   :  { %v285_v26 = vpop.f32.mrf.mxu0 }
  0xa7   :  { %443 = vst.msk [vmem:[%s975_s3] sm:$0xf] %vm442_vm0, %v421_v24  ;;  %v286_v27 = vadd.f32 %v859_v17, %v285_v26  ;;  %v348_v28 = vpop.f32.mrf.mxu1 }
  0xa9   :  { %v349_v29 = vadd.f32 %v348_v28, %v286_v27 }
  0xab   :  { %v401_v30 = vmax.f32 %v349_v29, 0.0 }
  0xac   :  { %v869_v31 = vpop.f32.mrf.mxu2 }
  0xad   :  { %v422_v32 = vpack.c.bf16 %v401_v30, %v401_v30  ;;  %v378_v33 = vpop.f32.mrf.mxu3 }
  0xae   :  { %v288_v34 = vpop.f32.mrf.mxu0 }
  0xaf   :  { %444 = vst.msk [vmem:[%s975_s3 + $0x4] sm:$0xf] %vm442_vm0, %v422_v32  ;;  %v289_v35 = vadd.f32 %v859_v17, %v288_v34  ;;  %v351_v36 = vpop.f32.mrf.mxu1 }
  0xb1   :  { %v352_v37 = vadd.f32 %v351_v36, %v289_v35 }
  0xb3   :  { %v402_v38 = vmax.f32 %v352_v37, 0.0 }
  0xb4   :  { %v313_v39 = vpop.f32.mrf.mxu2 }
  0xb5   :  { %v423_v40 = vpack.c.bf16 %v402_v38, %v402_v38  ;;  %v314_v41 = vadd.f32 %v859_v17, %v313_v39  ;;  %v381_v42 = vpop.f32.mrf.mxu3 }
  0xb6   :  { %v290_v43 = vpop.f32.mrf.mxu0 }
  0xb7   :  { %445 = vst.msk [vmem:[%s975_s3 + $0x8] sm:$0xf] %vm442_vm0, %v423_v40  ;;  %v377_v44 = vadd.f32 %v376_v25, %v314_v41  ;;  %v291_v45 = vadd.f32 %v859_v17, %v290_v43  ;;  %v353_v46 = vpop.f32.mrf.mxu1 }
  0xb9   :  { %v412_v47 = vmax.f32 %v377_v44, 0.0  ;;  %v354_v48 = vadd.f32 %v353_v46, %v291_v45 }
  0xbb   :  { %v433_v49 = vpack.c.bf16 %v412_v47, %v412_v47  ;;  %v403_v50 = vmax.f32 %v354_v48, 0.0 }
  0xbc   :  { %v315_v51 = vpop.f32.mrf.mxu2 }
  0xbd   :  { %455 = vst.msk [vmem:[%s975_s3 + $0x30] sm:$0xf] %vm442_vm0, %v433_v49  ;;  %v424_v52 = vpack.c.bf16 %v403_v50, %v403_v50  ;;  %v316_v53 = vadd.f32 %v859_v17, %v315_v51  ;;  %v383_v54 = vpop.f32.mrf.mxu3 }
  0xbe   :  { %v293_v55 = vpop.f32.mrf.mxu0 }
  0xbf   :  { %446 = vst.msk [vmem:[%s975_s3 + $0xc] sm:$0xf] %vm442_vm0, %v424_v52  ;;  %v379_v56 = vadd.f32 %v378_v33, %v316_v53  ;;  %v294_v57 = vadd.f32 %v859_v17, %v293_v55  ;;  %v356_v58 = vpop.f32.mrf.mxu1 }
  0xc1   :  { %v413_v59 = vmax.f32 %v379_v56, 0.0  ;;  %v357_v60 = vadd.f32 %v356_v58, %v294_v57 }
  0xc3   :  { %v434_v61 = vpack.c.bf16 %v413_v59, %v413_v59  ;;  %v404_v62 = vmax.f32 %v357_v60, 0.0 }
  0xc4   :  { %v318_v63 = vpop.f32.mrf.mxu2 }
  0xc5   :  { %456 = vst.msk [vmem:[%s975_s3 + $0x34] sm:$0xf] %vm442_vm0, %v434_v61  ;;  %v425_v0 = vpack.c.bf16 %v404_v62, %v404_v62  ;;  %v319_v1 = vadd.f32 %v859_v17, %v318_v63  ;;  %v386_v2 = vpop.f32.mrf.mxu3 }
  0xc6   :  { %v295_v3 = vpop.f32.mrf.mxu0 }
  0xc7   :  { %447 = vst.msk [vmem:[%s975_s3 + $0x10] sm:$0xf] %vm442_vm0, %v425_v0  ;;  %v382_v4 = vadd.f32 %v381_v42, %v319_v1  ;;  %v296_v5 = vadd.f32 %v859_v17, %v295_v3  ;;  %v358_v6 = vpop.f32.mrf.mxu1 }
  0xc9   :  { %v414_v7 = vmax.f32 %v382_v4, 0.0  ;;  %v359_v8 = vadd.f32 %v358_v6, %v296_v5 }
  0xcb   :  { %v435_v9 = vpack.c.bf16 %v414_v7, %v414_v7  ;;  %v405_v10 = vmax.f32 %v359_v8, 0.0 }
  0xcc   :  { %v320_v11 = vpop.f32.mrf.mxu2 }
  0xcd   :  { %457 = vst.msk [vmem:[%s975_s3 + $0x38] sm:$0xf] %vm442_vm0, %v435_v9  ;;  %v426_v12 = vpack.c.bf16 %v405_v10, %v405_v10  ;;  %v321_v13 = vadd.f32 %v859_v17, %v320_v11  ;;  %v388_v14 = vpop.f32.mrf.mxu3  ;;  %v311_v11 = vadd.f32 %v859_v17, %v869_v31 }
  0xce   :  { %v298_v15 = vpop.f32.mrf.mxu0 }
  0xcf   :  { %448 = vst.msk [vmem:[%s975_s3 + $0x14] sm:$0xf] %vm442_vm0, %v426_v12  ;;  %v384_v16 = vadd.f32 %v383_v54, %v321_v13  ;;  %v299_v18 = vadd.f32 %v859_v17, %v298_v15  ;;  %v361_v19 = vpop.f32.mrf.mxu1 }
  0xd1   :  { %v415_v20 = vmax.f32 %v384_v16, 0.0  ;;  %v362_v21 = vadd.f32 %v361_v19, %v299_v18 }
  0xd3   :  { %v436_v22 = vpack.c.bf16 %v415_v20, %v415_v20  ;;  %v406_v24 = vmax.f32 %v362_v21, 0.0 }
  0xd4   :  { %v323_v25 = vpop.f32.mrf.mxu2 }
  0xd5   :  { %458 = vst.msk [vmem:[%s975_s3 + $0x3c] sm:$0xf] %vm442_vm0, %v436_v22  ;;  %v427_v26 = vpack.c.bf16 %v406_v24, %v406_v24  ;;  %v324_v27 = vadd.f32 %v859_v17, %v323_v25  ;;  %v391_v28 = vpop.f32.mrf.mxu3 }
  0xd6   :  { %v300_v29 = vpop.f32.mrf.mxu0 }
  0xd7   :  { %449 = vst.msk [vmem:[%s975_s3 + $0x18] sm:$0xf] %vm442_vm0, %v427_v26  ;;  %v387_v30 = vadd.f32 %v386_v2, %v324_v27  ;;  %v301_v32 = vadd.f32 %v859_v17, %v300_v29  ;;  %v363_v33 = vpop.f32.mrf.mxu1  ;;  %v309_v2 = vadd.f32 %v859_v17, %v862_v23 }
  0xd9   :  { %v416_v34 = vmax.f32 %v387_v30, 0.0  ;;  %v364_v35 = vadd.f32 %v363_v33, %v301_v32 }
  0xdb   :  { %v437_v36 = vpack.c.bf16 %v416_v34, %v416_v34  ;;  %v407_v37 = vmax.f32 %v364_v35, 0.0 }
  0xdc   :  { %v325_v38 = vpop.f32.mrf.mxu2 }
  0xdd   :  { %459 = vst.msk [vmem:[%s975_s3 + $0x40] sm:$0xf] %vm442_vm0, %v437_v36  ;;  %v428_v39 = vpack.c.bf16 %v407_v37, %v407_v37  ;;  %v326_v40 = vadd.f32 %v859_v17, %v325_v38  ;;  %v393_v41 = vpop.f32.mrf.mxu3 }
  0xde   :  { %v303_v42 = vpop.f32.mrf.mxu0 }
  0xdf   :  { %450 = vst.msk [vmem:[%s975_s3 + $0x1c] sm:$0xf] %vm442_vm0, %v428_v39  ;;  %v389_v43 = vadd.f32 %v388_v14, %v326_v40  ;;  %v304_v44 = vadd.f32 %v859_v17, %v303_v42  ;;  %v366_v45 = vpop.f32.mrf.mxu1 }
  0xe1   :  { %v417_v46 = vmax.f32 %v389_v43, 0.0  ;;  %v367_v47 = vadd.f32 %v366_v45, %v304_v44 }
  0xe3   :  { %v438_v48 = vpack.c.bf16 %v417_v46, %v417_v46  ;;  %v408_v49 = vmax.f32 %v367_v47, 0.0 }
  0xe4   :  { %v328_v50 = vpop.f32.mrf.mxu2 }
  0xe5   :  { %460 = vst.msk [vmem:[%s975_s3 + $0x44] sm:$0xf] %vm442_vm0, %v438_v48  ;;  %v429_v51 = vpack.c.bf16 %v408_v49, %v408_v49  ;;  %v329_v52 = vadd.f32 %v859_v17, %v328_v50  ;;  %v396_v53 = vpop.f32.mrf.mxu3 }
  0xe6   :  { %v305_v54 = vpop.f32.mrf.mxu0 }
  0xe7   :  { %451 = vst.msk [vmem:[%s975_s3 + $0x20] sm:$0xf] %vm442_vm0, %v429_v51  ;;  %v392_v55 = vadd.f32 %v391_v28, %v329_v52  ;;  %v306_v56 = vadd.f32 %v859_v17, %v305_v54  ;;  %v368_v57 = vpop.f32.mrf.mxu1 }
  0xe9   :  { %v418_v58 = vmax.f32 %v392_v55, 0.0  ;;  %v369_v59 = vadd.f32 %v368_v57, %v306_v56 }
  0xeb   :  { %v439_v60 = vpack.c.bf16 %v418_v58, %v418_v58  ;;  %v409_v61 = vmax.f32 %v369_v59, 0.0 }
  0xec   :  { %v330_v62 = vpop.f32.mrf.mxu2 }
  0xed   :  { %461 = vst.msk [vmem:[%s975_s3 + $0x48] sm:$0xf] %vm442_vm0, %v439_v60  ;;  %v430_v63 = vpack.c.bf16 %v409_v61, %v409_v61  ;;  %v331_v0 = vadd.f32 %v859_v17, %v330_v62  ;;  %v398_v1 = vpop.f32.mrf.mxu3 }
  0xef   :  { %452 = vst.msk [vmem:[%s975_s3 + $0x24] sm:$0xf] %vm442_vm0, %v430_v63  ;;  %v394_v3 = vadd.f32 %v393_v41, %v331_v0  ;;  %v371_v4 = vpop.f32.mrf.mxu1 }
  0xf0   :  { %v372_v5 = vadd.f32 %v371_v4, %v309_v2 }
  0xf1   :  { %v419_v6 = vmax.f32 %v394_v3, 0.0 }
  0xf2   :  { %v410_v7 = vmax.f32 %v372_v5, 0.0 }
  0xf3   :  { %v440_v8 = vpack.c.bf16 %v419_v6, %v419_v6 }
  0xf4   :  { %v431_v9 = vpack.c.bf16 %v410_v7, %v410_v7  ;;  %v333_v10 = vpop.f32.mrf.mxu2 }
  0xf5   :  { %462 = vst.msk [vmem:[%s975_s3 + $0x4c] sm:$0xf] %vm442_vm0, %v440_v8  ;;  %v334_v23 = vadd.f32 %v859_v17, %v333_v10 }
  0xf6   :  { %453 = vst.msk [vmem:[%s975_s3 + $0x28] sm:$0xf] %vm442_vm0, %v431_v9 }
  0xf7   :  { %v397_v12 = vadd.f32 %v396_v53, %v334_v23  ;;  %v373_v13 = vpop.f32.mrf.mxu1 }
  0xf8   :  { %v374_v14 = vadd.f32 %v373_v13, %v311_v11 }
  0xf9   :  { %v420_v15 = vmax.f32 %v397_v12, 0.0 }
  0xfa   :  { %v411_v16 = vmax.f32 %v374_v14, 0.0 }
  0xfb   :  { %v441_v18 = vpack.c.bf16 %v420_v15, %v420_v15 }
  0xfc   :  { %v432_v19 = vpack.c.bf16 %v411_v16, %v411_v16  ;;  %v335_v20 = vpop.f32.mrf.mxu2 }
  0xfd   :  { %463 = vst.msk [vmem:[%s975_s3 + $0x50] sm:$0xf] %vm442_vm0, %v441_v18 }
  0xfe   :  { %454 = vst.msk [vmem:[%s975_s3 + $0x2c] sm:$0xf] %vm442_vm0, %v432_v19 }

// kernel: dqn_forward.5
= control target key start
LH: loop header
LB: loop body
LE: loop exit
PB: predicated region body
PF: predicated region fallthrough
CT: control target
= control target key end

     0   :  { %vm392_vm0 = vcmask 519168   ;;  %s742_s1 = inlined_call_operand.vmem [shape: bf16[512,64], index: 1, kind: input, shape index: {}]   ;;  %s743_s2 = inlined_call_operand.vmem [shape: f32[1,64], index: 2, kind: input, shape index: {}]   ;;  %s744_s0 = inlined_call_operand.vmem [shape: bf16[24,512], index: 0, kind: input, shape index: {}]   ;;  %s745_s3 = inlined_call_operand.vmem [shape: bf16[24,64], index: 3, kind: output, shape index: {}]  }
   0x1   :  { %v555_v0 = vld [vmem:[%s742_s1 + $0x38] sm:$0xff]  ;;  %v554_v4 = vld [vmem:[%s742_s1 + $0x30] sm:$0xff]  ;;  %v553_v8 = vld [vmem:[%s742_s1 + $0x28] sm:$0xff] }
   0x2   :  { %v563_v1 = vld [vmem:[%s742_s1 + $0x78] sm:$0xff]  ;;  %314 = vmatpush.bf16.msra.mxu0 %v555_v0  ;;  %v562_v5 = vld [vmem:[%s742_s1 + $0x70] sm:$0xff]  ;;  %v561_v9 = vld [vmem:[%s742_s1 + $0x68] sm:$0xff] }
   0x3   :  { %v571_v2 = vld [vmem:[%s742_s1 + $0xb8] sm:$0xff]  ;;  %332 = vmatpush.bf16.msra.mxu1 %v563_v1  ;;  %v570_v6 = vld [vmem:[%s742_s1 + $0xb0] sm:$0xff]  ;;  %v569_v10 = vld [vmem:[%s742_s1 + $0xa8] sm:$0xff] }
   0x4   :  { %v579_v3 = vld [vmem:[%s742_s1 + $0xf8] sm:$0xff]  ;;  %350 = vmatpush.bf16.msra.mxu2 %v571_v2  ;;  %v578_v7 = vld [vmem:[%s742_s1 + $0xf0] sm:$0xff]  ;;  %v577_v11 = vld [vmem:[%s742_s1 + $0xe8] sm:$0xff] }
   0x5   :  { %368 = vmatpush.bf16.msra.mxu3 %v579_v3  ;;  %v552_v12 = vld [vmem:[%s742_s1 + $0x20] sm:$0xff]  ;;  %v551_v16 = vld [vmem:[%s742_s1 + $0x18] sm:$0xff]  ;;  %v550_v20 = vld [vmem:[%s742_s1 + $0x10] sm:$0xff] }
   0x6   :  { %315 = vmatpush.bf16.msra.mxu0 %v554_v4  ;;  %v560_v13 = vld [vmem:[%s742_s1 + $0x60] sm:$0xff]  ;;  %v559_v17 = vld [vmem:[%s742_s1 + $0x58] sm:$0xff]  ;;  %v558_v21 = vld [vmem:[%s742_s1 + $0x50] sm:$0xff] }
   0x7   :  { %333 = vmatpush.bf16.msra.mxu1 %v562_v5  ;;  %v568_v14 = vld [vmem:[%s742_s1 + $0xa0] sm:$0xff]  ;;  %v567_v18 = vld [vmem:[%s742_s1 + $0x98] sm:$0xff]  ;;  %v566_v22 = vld [vmem:[%s742_s1 + $0x90] sm:$0xff] }
   0x8   :  { %351 = vmatpush.bf16.msra.mxu2 %v570_v6  ;;  %v576_v15 = vld [vmem:[%s742_s1 + $0xe0] sm:$0xff]  ;;  %v575_v19 = vld [vmem:[%s742_s1 + $0xd8] sm:$0xff]  ;;  %v574_v23 = vld [vmem:[%s742_s1 + $0xd0] sm:$0xff] }
   0x9   :  { %369 = vmatpush.bf16.msra.mxu3 %v578_v7  ;;  %v549_v24 = vld [vmem:[%s742_s1 + $0x8] sm:$0xff]  ;;  %v548_v28 = vld [vmem:[%s742_s1] sm:$0xff]  ;;  %v546_v33 = vld [vmem:[%s744_s0 + $0xc] sm:$0xf0] }
   0xa   :  { %316 = vmatpush.bf16.msra.mxu0 %v553_v8  ;;  %v557_v25 = vld [vmem:[%s742_s1 + $0x48] sm:$0xff]  ;;  %v556_v29 = vld [vmem:[%s742_s1 + $0x40] sm:$0xff]  ;;  %v404_v35 = vld [vmem:[%s744_s0 + $0x10] sm:$0xf0] }
   0xb   :  { %334 = vmatpush.bf16.msra.mxu1 %v561_v9  ;;  %v565_v26 = vld [vmem:[%s742_s1 + $0x88] sm:$0xff]  ;;  %v564_v30 = vld [vmem:[%s742_s1 + $0x80] sm:$0xff]  ;;  %v547_v37 = vld [vmem:[%s744_s0 + $0x14] sm:$0xf0] }
   0xc   :  { %352 = vmatpush.bf16.msra.mxu2 %v569_v10  ;;  %v573_v27 = vld [vmem:[%s742_s1 + $0xc8] sm:$0xff]  ;;  %v572_v31 = vld [vmem:[%s742_s1 + $0xc0] sm:$0xff]  ;;  %v412_v39 = vld [vmem:[%s744_s0 + $0x18] sm:$0xf0] }
   0xd   :  { %370 = vmatpush.bf16.msra.mxu3 %v577_v11  ;;  %v402_v32 = vld [vmem:[%s744_s0] sm:$0xf]  ;;  %v544_v34 = vld [vmem:[%s744_s0 + $0x4] sm:$0xf]  ;;  %v410_v36 = vld [vmem:[%s744_s0 + $0x8] sm:$0xf] }
   0xe   :  { %317 = vmatpush.bf16.msra.mxu0 %v552_v12  ;;  %v545_v38 = vld [vmem:[%s744_s0 + $0xc] sm:$0xf]  ;;  %v403_v40 = vor.u32 %v546_v33, %v402_v32  ;;  %v407_v41 = vor.u32 %v544_v34, %v404_v35  ;;  %v411_v42 = vor.u32 %v547_v37, %v410_v36  ;;  %v18_v44 = vld [vmem:[%s744_s0 + $0x20] sm:$0xff] }
   0xf   :  { %335 = vmatpush.bf16.msra.mxu1 %v560_v13  ;;  %v415_v43 = vor.u32 %v545_v38, %v412_v39  ;;  %v19_v45 = vld [vmem:[%s744_s0 + $0x28] sm:$0xff]  ;;  %v102_v46 = vunpack.c.l.b16 %v18_v44  ;;  %v103_v47 = vunpack.c.h.b16 %v18_v44  ;;  %v580_v54 = vld [vmem:[%s743_s2] ss:$0 sm:$0xff] }
  0x10   :  { %353 = vmatpush.bf16.msra.mxu2 %v568_v14  ;;  %v104_v48 = vunpack.c.l.b16 %v19_v45  ;;  %v105_v49 = vunpack.c.h.b16 %v19_v45 }
  0x11   :  { %371 = vmatpush.bf16.msra.mxu3 %v576_v15  ;;  %v110_v50 = vpack.c.b16 %v102_v46, %v102_v46  ;;  %v111_v51 = vpack.c.b16 %v103_v47, %v103_v47 }
  0x12   :  { %318 = vmatpush.bf16.msra.mxu0 %v551_v16  ;;  %v112_v52 = vpack.c.b16 %v104_v48, %v104_v48  ;;  %v113_v53 = vpack.c.b16 %v105_v49, %v105_v49 }
  0x13   :  { %336 = vmatpush.bf16.msra.mxu1 %v559_v17 }
  0x14   :  { %354 = vmatpush.bf16.msra.mxu2 %v567_v18 }
  0x15   :  { %372 = vmatpush.bf16.msra.mxu3 %v575_v19 }
  0x16   :  { %319 = vmatpush.bf16.msra.mxu0 %v550_v20 }
  0x17   :  { %337 = vmatpush.bf16.msra.mxu1 %v558_v21 }
  0x18   :  { %355 = vmatpush.bf16.msra.mxu2 %v566_v22 }
  0x19   :  { %373 = vmatpush.bf16.msra.mxu3 %v574_v23 }
  0x1a   :  { %320 = vmatpush.bf16.msra.mxu0 %v549_v24 }
  0x1b   :  { %338 = vmatpush.bf16.msra.mxu1 %v557_v25 }
  0x1c   :  { %356 = vmatpush.bf16.msra.mxu2 %v565_v26 }
  0x1d   :  { %374 = vmatpush.bf16.msra.mxu3 %v573_v27 }
  0x1e   :  { %321 = vmatpush.bf16.msra.mxu0 %v548_v28 }
  0x1f   :  { %339 = vmatpush.bf16.msra.mxu1 %v556_v29 }
  0x20   :  { %357 = vmatpush.bf16.msra.mxu2 %v564_v30 }
  0x21   :  { %375 = vmatpush.bf16.msra.mxu3 %v572_v31  ;;  %322 = vmatmul.bf16.vlgmr.msra.gmra.mxu0 %v403_v40 }
  0x22   :  { %340 = vmatmul.bf16.vlgmr.msra.gmra.mxu1 %v407_v41 }
  0x23   :  { %358 = vmatmul.bf16.vlgmr.msra.gmra.mxu2 %v411_v42 }
  0x24   :  { %376 = vmatmul.bf16.vlgmr.msra.gmra.mxu3 %v415_v43 }
  0x31   :  { %327 = vmatmul.bf16.gmra.mxu0 %v110_v50 }
  0x32   :  { %345 = vmatmul.bf16.gmra.mxu1 %v111_v51 }
  0x33   :  { %363 = vmatmul.bf16.gmra.mxu2 %v112_v52 }
  0x34   :  { %381 = vmatmul.bf16.gmra.mxu3 %v113_v53 }
  0x9e   :  { %v323_v55 = vpop.f32.mrf.mxu0 }
  0x9f   :  { %v341_v56 = vpop.f32.mrf.mxu1  ;;  %v324_v57 = vadd.f32 %v580_v54, %v323_v55 }
  0xa1   :  { %v342_v58 = vadd.f32 %v341_v56, %v324_v57 }
  0xa6   :  { %v359_v59 = vpop.f32.mrf.mxu2  ;;  %v325_v62 = vpop.f32.mrf.mxu0 }
  0xa7   :  { %v377_v60 = vpop.f32.mrf.mxu3  ;;  %v360_v61 = vadd.f32 %v359_v59, %v342_v58  ;;  %v343_v63 = vpop.f32.mrf.mxu1  ;;  %v326_v1 = vadd.f32 %v580_v54, %v325_v62 }
  0xa9   :  { %v378_v0 = vadd.f32 %v377_v60, %v360_v61  ;;  %v344_v4 = vadd.f32 %v343_v63, %v326_v1 }
  0xab   :  { %v386_v2 = vmax.f32 %v378_v0, 0.0 }
  0xad   :  { %v389_v3 = vpack.c.bf16 %v386_v2, %v386_v2 }
  0xae   :  { %v361_v5 = vpop.f32.mrf.mxu2  ;;  %v328_v8 = vpop.f32.mrf.mxu0 }
  0xaf   :  { %v379_v6 = vpop.f32.mrf.mxu3  ;;  %393 = vst.msk [vmem:[%s745_s3] sm:$0xf] %vm392_vm0, %v389_v3  ;;  %v362_v7 = vadd.f32 %v361_v5, %v344_v4  ;;  %v346_v9 = vpop.f32.mrf.mxu1  ;;  %v329_v10 = vadd.f32 %v580_v54, %v328_v8 }
  0xb1   :  { %v380_v11 = vadd.f32 %v379_v6, %v362_v7  ;;  %v347_v13 = vadd.f32 %v346_v9, %v329_v10 }
  0xb3   :  { %v387_v12 = vmax.f32 %v380_v11, 0.0 }
  0xb5   :  { %v390_v14 = vpack.c.bf16 %v387_v12, %v387_v12 }
  0xb6   :  { %v364_v15 = vpop.f32.mrf.mxu2  ;;  %v330_v18 = vpop.f32.mrf.mxu0 }
  0xb7   :  { %v382_v16 = vpop.f32.mrf.mxu3  ;;  %394 = vst.msk [vmem:[%s745_s3 + $0x4] sm:$0xf] %vm392_vm0, %v390_v14  ;;  %v365_v17 = vadd.f32 %v364_v15, %v347_v13  ;;  %v348_v19 = vpop.f32.mrf.mxu1 }
  0xb9   :  { %v383_v20 = vadd.f32 %v382_v16, %v365_v17 }
  0xbb   :  { %v388_v21 = vmax.f32 %v383_v20, 0.0 }
  0xbd   :  { %v391_v22 = vpack.c.bf16 %v388_v21, %v388_v21 }
  0xbe   :  { %v366_v23 = vpop.f32.mrf.mxu2 }
  0xbf   :  { %v384_v24 = vpop.f32.mrf.mxu3  ;;  %395 = vst.msk [vmem:[%s745_s3 + $0x8] sm:$0xf] %vm392_vm0, %v391_v22 }

// kernel: dqn_forward.6
= control target key start
LH: loop header
LB: loop body
LE: loop exit
PB: predicated region body
PF: predicated region fallthrough
CT: control target
= control target key end

     0   :  { %vm327_vm0 = vcmask 523264   ;;  %vm398_vm1 = vcmask 519168   ;;  %s729_s1 = inlined_call_operand.vmem [shape: bf16[576,64], index: 1, kind: input, shape index: {}]   ;;  %s730_s2 = inlined_call_operand.vmem [shape: f32[1,64], index: 2, kind: input, shape index: {}]   ;;  %s731_s0 = inlined_call_operand.vmem [shape: bf16[8,576], index: 0, kind: input, shape index: {}]   ;;  %s732_s3 = inlined_call_operand.vmem [shape: bf16[8,64], index: 3, kind: output, shape index: {}]  }
   0x1   :  { %v556_v0 = vld [vmem:[%s729_s1 + $0x38] sm:$0xff]  ;;  %v555_v4 = vld [vmem:[%s729_s1 + $0x30] sm:$0xff]  ;;  %v554_v8 = vld [vmem:[%s729_s1 + $0x28] sm:$0xff] }
   0x2   :  { %v572_v1 = vld [vmem:[%s729_s1 + $0xb8] sm:$0xff]  ;;  %331 = vmatpush.bf16.msra.mxu0 %v556_v0  ;;  %v571_v5 = vld [vmem:[%s729_s1 + $0xb0] sm:$0xff]  ;;  %v570_v9 = vld [vmem:[%s729_s1 + $0xa8] sm:$0xff] }
   0x3   :  { %v580_v2 = vld [vmem:[%s729_s1 + $0xf8] sm:$0xff]  ;;  %357 = vmatpush.bf16.msra.mxu2 %v572_v1  ;;  %v579_v6 = vld [vmem:[%s729_s1 + $0xf0] sm:$0xff]  ;;  %v578_v10 = vld [vmem:[%s729_s1 + $0xe8] sm:$0xff] }
   0x4   :  { %v564_v3 = vld [vmem:[%s729_s1 + $0x78] sm:$0xff]  ;;  %370 = vmatpush.bf16.msra.mxu3 %v580_v2  ;;  %v563_v7 = vld [vmem:[%s729_s1 + $0x70] sm:$0xff]  ;;  %v562_v11 = vld [vmem:[%s729_s1 + $0x68] sm:$0xff] }
   0x5   :  { %344 = vmatpush.bf16.msra.mxu1 %v564_v3  ;;  %v553_v12 = vld [vmem:[%s729_s1 + $0x20] sm:$0xff]  ;;  %v552_v16 = vld [vmem:[%s729_s1 + $0x18] sm:$0xff]  ;;  %v551_v20 = vld [vmem:[%s729_s1 + $0x10] sm:$0xff] }
   0x6   :  { %332 = vmatpush.bf16.msra.mxu0 %v555_v4  ;;  %v569_v13 = vld [vmem:[%s729_s1 + $0xa0] sm:$0xff]  ;;  %v568_v17 = vld [vmem:[%s729_s1 + $0x98] sm:$0xff]  ;;  %v567_v21 = vld [vmem:[%s729_s1 + $0x90] sm:$0xff] }
   0x7   :  { %358 = vmatpush.bf16.msra.mxu2 %v571_v5  ;;  %v577_v14 = vld [vmem:[%s729_s1 + $0xe0] sm:$0xff]  ;;  %v576_v18 = vld [vmem:[%s729_s1 + $0xd8] sm:$0xff]  ;;  %v575_v22 = vld [vmem:[%s729_s1 + $0xd0] sm:$0xff] }
   0x8   :  { %371 = vmatpush.bf16.msra.mxu3 %v579_v6  ;;  %v561_v15 = vld [vmem:[%s729_s1 + $0x60] sm:$0xff]  ;;  %v560_v19 = vld [vmem:[%s729_s1 + $0x58] sm:$0xff]  ;;  %v559_v23 = vld [vmem:[%s729_s1 + $0x50] sm:$0xff] }
   0x9   :  { %345 = vmatpush.bf16.msra.mxu1 %v563_v7  ;;  %v550_v24 = vld [vmem:[%s729_s1 + $0x8] sm:$0xff]  ;;  %v15_v26 = vld [vmem:[%s731_s0] sm:$0xff]  ;;  %v584_v38 = vld [vmem:[%s729_s1 + $0x118] sm:$0xff] }
   0xa   :  { %333 = vmatpush.bf16.msra.mxu0 %v554_v8  ;;  %v566_v25 = vld [vmem:[%s729_s1 + $0x88] sm:$0xff]  ;;  %v97_v30 = vunpack.c.l.b16 %v15_v26  ;;  %v549_v32 = vld [vmem:[%s729_s1] sm:$0xff]  ;;  %v98_v35 = vunpack.c.h.b16 %v15_v26  ;;  %v583_v43 = vld [vmem:[%s729_s1 + $0x110] sm:$0xff] }
   0xb   :  { %359 = vmatpush.bf16.msra.mxu2 %v570_v9  ;;  %v16_v27 = vld [vmem:[%s731_s0 + $0x8] sm:$0xff]  ;;  %v565_v33 = vld [vmem:[%s729_s1 + $0x80] sm:$0xff]  ;;  %v17_v45 = vld [vmem:[%s731_s0 + $0x10] sm:$0xf] }
   0xc   :  { %372 = vmatpush.bf16.msra.mxu3 %v578_v10  ;;  %v574_v28 = vld [vmem:[%s729_s1 + $0xc8] sm:$0xff]  ;;  %v99_v31 = vunpack.c.l.b16 %v16_v27  ;;  %v100_v34 = vunpack.c.h.b16 %v16_v27  ;;  %v573_v36 = vld [vmem:[%s729_s1 + $0xc0] sm:$0xff]  ;;  %v102_v39 = vpack.c.b16 %v97_v30, %v97_v30  ;;  %v103_v42 = vpack.c.b16 %v98_v35, %v98_v35 }
   0xd   :  { %346 = vmatpush.bf16.msra.mxu1 %v562_v11  ;;  %v558_v29 = vld [vmem:[%s729_s1 + $0x48] sm:$0xff]  ;;  %v557_v37 = vld [vmem:[%s729_s1 + $0x40] sm:$0xff]  ;;  %v101_v47 = vunpack.c.l.b16 %v17_v45 }
   0xe   :  { %334 = vmatpush.bf16.msra.mxu0 %v553_v12  ;;  %v104_v40 = vpack.c.b16 %v99_v31, %v99_v31  ;;  %v105_v41 = vpack.c.b16 %v100_v34, %v100_v34  ;;  %v582_v44 = vld [vmem:[%s729_s1 + $0x108] sm:$0xff]  ;;  %v581_v46 = vld [vmem:[%s729_s1 + $0x100] sm:$0xff] }
   0xf   :  { %360 = vmatpush.bf16.msra.mxu2 %v569_v13  ;;  %v106_v48 = vpack.c.b16 %v101_v47, %v101_v47  ;;  %v585_v50 = vld [vmem:[%s730_s2] ss:$0 sm:$0xff] }
  0x10   :  { %373 = vmatpush.bf16.msra.mxu3 %v577_v14 }
  0x11   :  { %347 = vmatpush.bf16.msra.mxu1 %v561_v15 }
  0x12   :  { %335 = vmatpush.bf16.msra.mxu0 %v552_v16 }
  0x13   :  { %361 = vmatpush.bf16.msra.mxu2 %v568_v17 }
  0x14   :  { %374 = vmatpush.bf16.msra.mxu3 %v576_v18 }
  0x15   :  { %348 = vmatpush.bf16.msra.mxu1 %v560_v19 }
  0x16   :  { %336 = vmatpush.bf16.msra.mxu0 %v551_v20 }
  0x17   :  { %362 = vmatpush.bf16.msra.mxu2 %v567_v21 }
  0x18   :  { %375 = vmatpush.bf16.msra.mxu3 %v575_v22 }
  0x19   :  { %349 = vmatpush.bf16.msra.mxu1 %v559_v23 }
  0x1a   :  { %337 = vmatpush.bf16.msra.mxu0 %v550_v24 }
  0x1b   :  { %363 = vmatpush.bf16.msra.mxu2 %v566_v25 }
  0x1c   :  { %376 = vmatpush.bf16.msra.mxu3 %v574_v28 }
  0x1d   :  { %350 = vmatpush.bf16.msra.mxu1 %v558_v29 }
  0x1e   :  { %338 = vmatpush.bf16.msra.mxu0 %v549_v32 }
  0x1f   :  { %364 = vmatpush.bf16.msra.mxu2 %v565_v33 }
  0x20   :  { %377 = vmatpush.bf16.msra.mxu3 %v573_v36 }
  0x21   :  { %351 = vmatpush.bf16.msra.mxu1 %v557_v37  ;;  %339 = vmatmul.bf16.vlgmr.msra.gmra.mxu0 %v102_v39 }
  0x22   :  { %387 = vmatpush.bf16.msrb.mxu0 %v584_v38  ;;  %365 = vmatmul.bf16.vlgmr.msra.gmra.mxu2 %v104_v40 }
  0x23   :  { %378 = vmatmul.bf16.vlgmr.msra.gmra.mxu3 %v105_v41 }
  0x24   :  { %352 = vmatmul.bf16.vlgmr.msra.gmra.mxu1 %v103_v42 }
  0x26   :  { %388 = vmatpush.bf16.msrb.mxu0 %v583_v43 }
  0x2a   :  { %389 = vmatpush.bf16.msrb.mxu0 %v582_v44 }
  0x2e   :  { %390 = vmatpush.bf16.msrb.mxu0 %v581_v46 }
  0x31   :  { %548 = vmatmul.msk.bf16.vlgmr.msrb.gmra.mxu0 %vm327_vm0, %v106_v48 }
  0x9e   :  { %v340_v49 = vpop.f32.mrf.mxu0 }
  0x9f   :  { %v341_v52 = vadd.f32 %v585_v50, %v340_v49 }
  0xa1   :  { %v353_v51 = vpop.f32.mrf.mxu1 }
  0xa2   :  { %v354_v56 = vadd.f32 %v353_v51, %v341_v52 }
  0xa5   :  { %v366_v53 = vpop.f32.mrf.mxu2 }
  0xa6   :  { %v379_v54 = vpop.f32.mrf.mxu3  ;;  %v342_v55 = vpop.f32.mrf.mxu0  ;;  %v367_v58 = vadd.f32 %v366_v53, %v354_v56 }
  0xa8   :  { %v380_v60 = vadd.f32 %v379_v54, %v367_v58 }
  0xa9   :  { %v355_v57 = vpop.f32.mrf.mxu1 }
  0xad   :  { %v368_v59 = vpop.f32.mrf.mxu2 }
  0xae   :  { %v381_v61 = vpop.f32.mrf.mxu3  ;;  %v392_v62 = vpop.f32.mrf.mxu0 }
  0xaf   :  { %v393_v63 = vadd.f32 %v392_v62, %v380_v60 }
  0xb1   :  { %v396_v0 = vmax.f32 %v393_v63, 0.0 }
  0xb3   :  { %v397_v1 = vpack.c.bf16 %v396_v0, %v396_v0 }
  0xb5   :  { %399 = vst.msk [vmem:[%s732_s3] sm:$0xf] %vm398_vm1, %v397_v1 }
  0xb6   :  { %v394_v2 = vpop.f32.mrf.mxu0 }

// kernel: dqn_forward.7
= control target key start
LH: loop header
LB: loop body
LE: loop exit
PB: predicated region body
PF: predicated region fallthrough
CT: control target
= control target key end

     0   :  { %vm128_vm0 = vcmask 523264   ;;  %vm504_vm1 = vcmask 64512   ;;  %s989_s1 = inlined_call_operand.vmem [shape: bf16[64,512], index: 1, kind: input, shape index: {}]   ;;  %s990_s3 = inlined_call_operand.vmem [shape: bf16[512,8], index: 3, kind: input, shape index: {}]   ;;  %s991_s0 = inlined_call_operand.vmem [shape: bf16[8,64], index: 0, kind: input, shape index: {}]   ;;  %s992_s4 = inlined_call_operand.vmem [shape: f32[1,8], index: 4, kind: input, shape index: {}]   ;;  %s993_s2 = inlined_call_operand.vmem [shape: f32[1,512], index: 2, kind: input, shape index: {}]   ;;  %s994_s5 = inlined_call_operand.vmem [shape: f32[8,8], index: 5, kind: output, shape index: {}]  }
   0x1   :  { %v568_v0 = vld [vmem:[%s989_s1 + $0x68] sm:$0xf]  ;;  %v721_v1 = vld [vmem:[%s989_s1 + $0x74] sm:$0xf0]  ;;  %v719_v2 = vld [vmem:[%s989_s1 + $0x6c] sm:$0xf] }
   0x2   :  { %v569_v3 = vor.u32 %v721_v1, %v568_v0  ;;  %v570_v4 = vld [vmem:[%s989_s1 + $0x78] sm:$0xf0]  ;;  %v560_v5 = vld [vmem:[%s989_s1 + $0x60] sm:$0xf]  ;;  %v720_v6 = vld [vmem:[%s989_s1 + $0x6c] sm:$0xf0] }
   0x3   :  { %v573_v7 = vor.u32 %v719_v2, %v570_v4  ;;  %v561_v8 = vor.u32 %v720_v6, %v560_v5  ;;  %v718_v9 = vld [vmem:[%s989_s1 + $0x64] sm:$0xf]  ;;  %v562_v10 = vld [vmem:[%s989_s1 + $0x70] sm:$0xf0]  ;;  %v552_v11 = vld [vmem:[%s989_s1 + $0x48] sm:$0xf] }
   0x4   :  { %162 = vmatpush.bf16.msra.mxu2 %v569_v3  ;;  %v565_v12 = vor.u32 %v718_v9, %v562_v10  ;;  %v717_v13 = vld [vmem:[%s989_s1 + $0x54] sm:$0xf0]  ;;  %v715_v14 = vld [vmem:[%s989_s1 + $0x4c] sm:$0xf]  ;;  %v554_v15 = vld [vmem:[%s989_s1 + $0x58] sm:$0xf0] }
   0x5   :  { %175 = vmatpush.bf16.msra.mxu3 %v573_v7  ;;  %136 = vmatpush.bf16.msra.mxu0 %v561_v8  ;;  %v553_v16 = vor.u32 %v717_v13, %v552_v11  ;;  %v557_v17 = vor.u32 %v715_v14, %v554_v15  ;;  %v544_v18 = vld [vmem:[%s989_s1 + $0x40] sm:$0xf]  ;;  %v716_v19 = vld [vmem:[%s989_s1 + $0x4c] sm:$0xf0]  ;;  %v714_v20 = vld [vmem:[%s989_s1 + $0x44] sm:$0xf] }
   0x6   :  { %149 = vmatpush.bf16.msra.mxu1 %v565_v12  ;;  %v545_v21 = vor.u32 %v716_v19, %v544_v18  ;;  %v546_v22 = vld [vmem:[%s989_s1 + $0x50] sm:$0xf0]  ;;  %v536_v23 = vld [vmem:[%s989_s1 + $0x28] sm:$0xf]  ;;  %v713_v24 = vld [vmem:[%s989_s1 + $0x34] sm:$0xf0] }
   0x7   :  { %v549_v25 = vor.u32 %v714_v20, %v546_v22  ;;  %v711_v26 = vld [vmem:[%s989_s1 + $0x2c] sm:$0xf]  ;;  %v538_v27 = vld [vmem:[%s989_s1 + $0x38] sm:$0xf0]  ;;  %v528_v28 = vld [vmem:[%s989_s1 + $0x20] sm:$0xf]  ;;  %v537_v29 = vor.u32 %v713_v24, %v536_v23 }
   0x8   :  { %163 = vmatpush.bf16.msra.mxu2 %v553_v16  ;;  %v712_v30 = vld [vmem:[%s989_s1 + $0x2c] sm:$0xf0]  ;;  %v710_v31 = vld [vmem:[%s989_s1 + $0x24] sm:$0xf]  ;;  %v530_v32 = vld [vmem:[%s989_s1 + $0x30] sm:$0xf0]  ;;  %v541_v33 = vor.u32 %v711_v26, %v538_v27 }
   0x9   :  { %176 = vmatpush.bf16.msra.mxu3 %v557_v17  ;;  %137 = vmatpush.bf16.msra.mxu0 %v545_v21  ;;  %v529_v34 = vor.u32 %v712_v30, %v528_v28  ;;  %v520_v35 = vld [vmem:[%s989_s1 + $0x8] sm:$0xf]  ;;  %v709_v36 = vld [vmem:[%s989_s1 + $0x14] sm:$0xf0]  ;;  %v707_v37 = vld [vmem:[%s989_s1 + $0xc] sm:$0xf]  ;;  %v533_v38 = vor.u32 %v710_v31, %v530_v32 }
   0xa   :  { %150 = vmatpush.bf16.msra.mxu1 %v549_v25  ;;  %v522_v39 = vld [vmem:[%s989_s1 + $0x18] sm:$0xf0]  ;;  %v512_v40 = vld [vmem:[%s989_s1] sm:$0xf]  ;;  %v708_v41 = vld [vmem:[%s989_s1 + $0xc] sm:$0xf0]  ;;  %v521_v44 = vor.u32 %v709_v36, %v520_v35 }
   0xb   :  { %v706_v42 = vld [vmem:[%s989_s1 + $0x4] sm:$0xf]  ;;  %v514_v43 = vld [vmem:[%s989_s1 + $0x10] sm:$0xf0]  ;;  %v525_v45 = vor.u32 %v707_v37, %v522_v39  ;;  %v513_v46 = vor.u32 %v708_v41, %v512_v40  ;;  %v729_v48 = vld [vmem:[%s990_s3 + $0x38] sm:$0xff] }
   0xc   :  { %164 = vmatpush.bf16.msra.mxu2 %v537_v29  ;;  %v517_v47 = vor.u32 %v706_v42, %v514_v43  ;;  %v737_v49 = vld [vmem:[%s990_s3 + $0x78] sm:$0xff]  ;;  %v21_v50 = vld [vmem:[%s991_s0] sm:$0xf]  ;;  %v728_v53 = vld [vmem:[%s990_s3 + $0x30] sm:$0xff] }
   0xd   :  { %177 = vmatpush.bf16.msra.mxu3 %v541_v33  ;;  %138 = vmatpush.bf16.msra.mxu0 %v529_v34  ;;  %v745_v51 = vld [vmem:[%s990_s3 + $0xb8] sm:$0xff]  ;;  %v736_v54 = vld [vmem:[%s990_s3 + $0x70] sm:$0xff]  ;;  %v727_v57 = vld [vmem:[%s990_s3 + $0x28] sm:$0xff] }
   0xe   :  { %151 = vmatpush.bf16.msra.mxu1 %v533_v38  ;;  %v753_v52 = vld [vmem:[%s990_s3 + $0xf8] sm:$0xff]  ;;  %v744_v55 = vld [vmem:[%s990_s3 + $0xb0] sm:$0xff]  ;;  %v735_v58 = vld [vmem:[%s990_s3 + $0x68] sm:$0xff] }
   0xf   :  { %v752_v56 = vld [vmem:[%s990_s3 + $0xf0] sm:$0xff]  ;;  %v743_v59 = vld [vmem:[%s990_s3 + $0xa8] sm:$0xff]  ;;  %v726_v61 = vld [vmem:[%s990_s3 + $0x20] sm:$0xff] }
  0x10   :  { %165 = vmatpush.bf16.msra.mxu2 %v521_v44  ;;  %v751_v60 = vld [vmem:[%s990_s3 + $0xe8] sm:$0xff]  ;;  %v734_v62 = vld [vmem:[%s990_s3 + $0x60] sm:$0xff]  ;;  %v725_v1 = vld [vmem:[%s990_s3 + $0x18] sm:$0xff] }
  0x11   :  { %178 = vmatpush.bf16.msra.mxu3 %v525_v45  ;;  %139 = vmatpush.bf16.msra.mxu0 %v513_v46  ;;  %v742_v63 = vld [vmem:[%s990_s3 + $0xa0] sm:$0xff]  ;;  %v733_v2 = vld [vmem:[%s990_s3 + $0x58] sm:$0xff]  ;;  %v724_v5 = vld [vmem:[%s990_s3 + $0x10] sm:$0xff] }
  0x12   :  { %152 = vmatpush.bf16.msra.mxu1 %v517_v47  ;;  %v750_v0 = vld [vmem:[%s990_s3 + $0xe0] sm:$0xff]  ;;  %v741_v3 = vld [vmem:[%s990_s3 + $0x98] sm:$0xff]  ;;  %v732_v6 = vld [vmem:[%s990_s3 + $0x50] sm:$0xff] }
  0x13   :  { %576 = vmatmul.msk.bf16.vlgmr.msra.gmra.mxu2 %vm128_vm0, %v21_v50  ;;  %v749_v4 = vld [vmem:[%s990_s3 + $0xd8] sm:$0xff]  ;;  %v740_v7 = vld [vmem:[%s990_s3 + $0x90] sm:$0xff]  ;;  %v723_v9 = vld [vmem:[%s990_s3 + $0x8] sm:$0xff] }
  0x14   :  { %577 = vmatmul.msk.bf16.vlgmr.msra.gmra.mxu3 %vm128_vm0, %v21_v50  ;;  %574 = vmatmul.msk.bf16.vlgmr.msra.gmra.mxu0 %vm128_vm0, %v21_v50  ;;  %v748_v8 = vld [vmem:[%s990_s3 + $0xd0] sm:$0xff]  ;;  %v731_v10 = vld [vmem:[%s990_s3 + $0x48] sm:$0xff]  ;;  %v722_v13 = vld [vmem:[%s990_s3] sm:$0xff] }
  0x15   :  { %452 = vmatpush.bf16.msrb.mxu0 %v729_v48  ;;  %575 = vmatmul.msk.bf16.vlgmr.msra.gmra.mxu1 %vm128_vm0, %v21_v50  ;;  %v739_v11 = vld [vmem:[%s990_s3 + $0x88] sm:$0xff]  ;;  %v730_v14 = vld [vmem:[%s990_s3 + $0x40] sm:$0xff] }
  0x16   :  { %465 = vmatpush.bf16.msrb.mxu1 %v737_v49  ;;  %478 = vmatpush.bf16.msrb.mxu2 %v745_v51  ;;  %v747_v12 = vld [vmem:[%s990_s3 + $0xc8] sm:$0xff]  ;;  %v738_v15 = vld [vmem:[%s990_s3 + $0x80] sm:$0xff] }
  0x17   :  { %491 = vmatpush.bf16.msrb.mxu3 %v753_v52  ;;  %v746_v16 = vld [vmem:[%s990_s3 + $0xc0] sm:$0xff] }
  0x18   :  { %v38_v17 = vld [vmem:[%s993_s2] sm:$0xf] }
  0x19   :  { %453 = vmatpush.bf16.msrb.mxu0 %v728_v53  ;;  %v40_v18 = vperm.slane %v38_v17, 0  ;;  %v41_v19 = vperm.slane %v38_v17, 1  ;;  %v42_v24 = vperm.slane %v38_v17, 2  ;;  %v43_v26 = vperm.slane %v38_v17, 3  ;;  %v754_v42 = vld [vmem:[%s992_s4] ss:$0 sm:$0xff] }
  0x1a   :  { %466 = vmatpush.bf16.msrb.mxu1 %v736_v54  ;;  %479 = vmatpush.bf16.msrb.mxu2 %v744_v55 }
  0x1b   :  { %492 = vmatpush.bf16.msrb.mxu3 %v752_v56 }
  0x1d   :  { %454 = vmatpush.bf16.msrb.mxu0 %v727_v57 }
  0x1e   :  { %467 = vmatpush.bf16.msrb.mxu1 %v735_v58  ;;  %480 = vmatpush.bf16.msrb.mxu2 %v743_v59 }
  0x1f   :  { %493 = vmatpush.bf16.msrb.mxu3 %v751_v60 }
  0x21   :  { %455 = vmatpush.bf16.msrb.mxu0 %v726_v61 }
  0x22   :  { %468 = vmatpush.bf16.msrb.mxu1 %v734_v62  ;;  %481 = vmatpush.bf16.msrb.mxu2 %v742_v63 }
  0x23   :  { %494 = vmatpush.bf16.msrb.mxu3 %v750_v0 }
  0x25   :  { %456 = vmatpush.bf16.msrb.mxu0 %v725_v1 }
  0x26   :  { %469 = vmatpush.bf16.msrb.mxu1 %v733_v2  ;;  %482 = vmatpush.bf16.msrb.mxu2 %v741_v3 }
  0x27   :  { %495 = vmatpush.bf16.msrb.mxu3 %v749_v4 }
  0x29   :  { %457 = vmatpush.bf16.msrb.mxu0 %v724_v5 }
  0x2a   :  { %470 = vmatpush.bf16.msrb.mxu1 %v732_v6  ;;  %483 = vmatpush.bf16.msrb.mxu2 %v740_v7 }
  0x2b   :  { %496 = vmatpush.bf16.msrb.mxu3 %v748_v8 }
  0x2d   :  { %458 = vmatpush.bf16.msrb.mxu0 %v723_v9 }
  0x2e   :  { %471 = vmatpush.bf16.msrb.mxu1 %v731_v10  ;;  %484 = vmatpush.bf16.msrb.mxu2 %v739_v11 }
  0x2f   :  { %497 = vmatpush.bf16.msrb.mxu3 %v747_v12 }
  0x31   :  { %459 = vmatpush.bf16.msrb.mxu0 %v722_v13 }
  0x32   :  { %472 = vmatpush.bf16.msrb.mxu1 %v730_v14  ;;  %485 = vmatpush.bf16.msrb.mxu2 %v738_v15 }
  0x33   :  { %498 = vmatpush.bf16.msrb.mxu3 %v746_v16 }
  0x91   :  { %v141_v20 = vpop.f32.mrf.mxu0 }
  0x92   :  { %v142_v21 = vadd.f32 %v141_v20, %v40_v18  ;;  %v154_v22 = vpop.f32.mrf.mxu1 }
  0x93   :  { %v155_v23 = vadd.f32 %v154_v22, %v41_v19 }
  0x94   :  { %v184_v25 = vmax.f32 %v142_v21, 0.0 }
  0x95   :  { %v185_v27 = vmax.f32 %v155_v23, 0.0 }
  0x96   :  { %v188_v28 = vpack.c.bf16 %v184_v25, %v184_v25  ;;  %v167_v29 = vpop.f32.mrf.mxu2 }
  0x97   :  { %v189_v30 = vpack.c.bf16 %v185_v27, %v185_v27  ;;  %v168_v31 = vadd.f32 %v167_v29, %v42_v24  ;;  %v180_v32 = vpop.f32.mrf.mxu3 }
  0x98   :  { %v181_v33 = vadd.f32 %v180_v32, %v43_v26  ;;  %460 = vmatmul.bf16.vlgmr.msrb.gmra.mxu0 %v188_v28 }
  0x99   :  { %v186_v34 = vmax.f32 %v168_v31, 0.0  ;;  %v143_v35 = vpop.f32.mrf.mxu0  ;;  %473 = vmatmul.bf16.vlgmr.msrb.gmra.mxu1 %v189_v30 }
  0x9a   :  { %v187_v36 = vmax.f32 %v181_v33, 0.0  ;;  %v156_v37 = vpop.f32.mrf.mxu1 }
  0x9b   :  { %v190_v38 = vpack.c.bf16 %v186_v34, %v186_v34 }
  0x9c   :  { %v191_v39 = vpack.c.bf16 %v187_v36, %v187_v36 }
  0x9d   :  { %486 = vmatmul.bf16.vlgmr.msrb.gmra.mxu2 %v190_v38 }
  0x9e   :  { %499 = vmatmul.bf16.vlgmr.msrb.gmra.mxu3 %v191_v39  ;;  %v169_v40 = vpop.f32.mrf.mxu2 }
  0x9f   :  { %v182_v41 = vpop.f32.mrf.mxu3 }
 0x115   :  { %v461_v43 = vpop.f32.mrf.mxu0 }
 0x116   :  { %v474_v44 = vpop.f32.mrf.mxu1  ;;  %v462_v45 = vadd.f32 %v754_v42, %v461_v43 }
 0x118   :  { %v475_v46 = vadd.f32 %v474_v44, %v462_v45 }
 0x11d   :  { %v463_v47 = vpop.f32.mrf.mxu0 }
 0x11e   :  { %v476_v48 = vpop.f32.mrf.mxu1 }
 0x120   :  { %v487_v49 = vpop.f32.mrf.mxu2 }
 0x121   :  { %v488_v50 = vadd.f32 %v487_v49, %v475_v46  ;;  %v500_v51 = vpop.f32.mrf.mxu3 }
 0x123   :  { %v501_v52 = vadd.f32 %v500_v51, %v488_v50 }
 0x125   :  { %505 = vst.msk [vmem:[%s994_s5] sm:$0xff] %vm504_vm1, %v501_v52 }
 0x128   :  { %v489_v53 = vpop.f32.mrf.mxu2 }
 0x129   :  { %v502_v54 = vpop.f32.mrf.mxu3 }

</bundles_post_ra>
